<compile_context>
chip_gen: v7x
topology: tpu7x:2x2x1
jax: 0.10.0
libtpu: 0.0.40
codegen_flags: <defaults>
</compile_context>

<pallas_src>
import jax
import jax.numpy as jnp
from jax.experimental import pallas as pl
from jax.experimental.pallas import tpu as pltpu

BN_EPS = 1e-5
_FUSED_VMEM_BUDGET_BYTES = 16 * 1024 * 1024   # conservative; default scoped VMEM is 32 MiB


def _h_swish(y):
    return y * jnp.clip(y + 3.0, 0.0, 6.0) * (1.0 / 6.0)


# ---------------------------------------------------------------------------
# Fused single-pass kernel (one grid point per sample):
#   pool -> conv1(+folded BN) -> h_swish -> conv_h/conv_w -> sigmoid -> gate x
# ---------------------------------------------------------------------------
def fused_kernel(x_ref, ph_ref, pw_ref, rh_ref, rw_ref,
                 w1_ref, b1_ref, wh_ref, bh_ref, ww_ref, bw_ref, o_ref):
    x = x_ref[...]                                                      # (c, hw)

    # Coordinate pooling as matmuls on the MXU (P matrices carry 1/W and 1/H).
    x_h = jnp.dot(x, ph_ref[...], preferred_element_type=jnp.float32)  # (c, h)
    x_w = jnp.dot(x, pw_ref[...], preferred_element_type=jnp.float32)  # (c, w)

    # conv1 (1x1, BN folded) + h_swish, per branch (no concat/split needed).
    def branch(p):
        y = jnp.dot(w1_ref[...], p,
                    preferred_element_type=jnp.float32) + b1_ref[...]
        return _h_swish(y)

    y_h = branch(x_h)                                                   # (mip, h)
    y_w = branch(x_w)                                                   # (mip, w)

    a_h = jax.nn.sigmoid(
        jnp.dot(wh_ref[...], y_h, preferred_element_type=jnp.float32)
        + bh_ref[...])                                                  # (oup, h)
    a_w = jax.nn.sigmoid(
        jnp.dot(ww_ref[...], y_w, preferred_element_type=jnp.float32)
        + bw_ref[...])                                                  # (oup, w)

    # Expand gates to (oup, hw) via constant 0/1 selection matmuls (MXU idle),
    # avoiding any in-kernel reshape of the lane-dense streaming tile.
    gh = jnp.dot(a_h, rh_ref[...], preferred_element_type=jnp.float32)  # (oup, hw)
    gw = jnp.dot(a_w, rw_ref[...], preferred_element_type=jnp.float32)  # (oup, hw)

    o_ref[...] = (x * gh * gw).astype(o_ref.dtype)


# ---------------------------------------------------------------------------
# Two-pass fallback (large per-sample tensors).
# Kernel 1: per-sample attention gates  a_h (oup, H), a_w (oup, W)
# ---------------------------------------------------------------------------
def gates_kernel(x_ref, ph_ref, pw_ref, w1_ref, b1_ref, wh_ref, bh_ref,
                 ww_ref, bw_ref, ah_ref, aw_ref):
    x = x_ref[...]                                                      # (c, hw)
    x_h = jnp.dot(x, ph_ref[...], preferred_element_type=jnp.float32)  # (c, h)
    x_w = jnp.dot(x, pw_ref[...], preferred_element_type=jnp.float32)  # (c, w)

    def branch(p):
        y = jnp.dot(w1_ref[...], p,
                    preferred_element_type=jnp.float32) + b1_ref[...]
        return _h_swish(y)

    y_h = branch(x_h)                                                   # (mip, h)
    y_w = branch(x_w)                                                   # (mip, w)

    ah_ref[...] = jax.nn.sigmoid(
        jnp.dot(wh_ref[...], y_h, preferred_element_type=jnp.float32)
        + bh_ref[...])                                                  # (oup, h)
    aw_ref[...] = jax.nn.sigmoid(
        jnp.dot(ww_ref[...], y_w, preferred_element_type=jnp.float32)
        + bw_ref[...])                                                  # (oup, w)


# ---------------------------------------------------------------------------
# Kernel 2 (fallback): streaming gating  out[c, h*W+w] = x * a_h[c,h] * a_w[c,w]
# ---------------------------------------------------------------------------
def gating_kernel(x_ref, ah_ref, aw_ref, rh_ref, rw_ref, o_ref):
    gh = jnp.dot(ah_ref[...], rh_ref[...],
                 preferred_element_type=jnp.float32)                    # (tc, hw)
    gw = jnp.dot(aw_ref[...], rw_ref[...],
                 preferred_element_type=jnp.float32)                    # (tc, hw)
    o_ref[...] = (x_ref[...] * gh * gw).astype(o_ref.dtype)


def _pick_channel_tile(c):
    if c <= 128:
        return c                      # single tile (block == full dim is legal)
    for cand in (128, 64, 32, 16, 8):
        if c % cand == 0:
            return cand
    return c


def coord_att(x, params, force_two_pass=False):
    n, c, h, w = x.shape
    hw = h * w
    mip = params["w1"].shape[0]
    oup = params["wh"].shape[0]
    assert oup == c, "CoordAtt gating requires oup == input channels"
    f32 = jnp.float32

    # ---- fold BatchNorm (eval) into conv1 (pure algebra, done at trace time) ----
    inv = params["gamma"] * jax.lax.rsqrt(params["var"] + BN_EPS)        # (mip,1)
    w1f = (params["w1"] * inv).astype(f32)                               # (mip,c)
    b1f = ((params["b1"] - params["mean"]) * inv + params["beta"]).astype(f32)

    # ---- constant pooling / expansion matrices ----
    s = jnp.arange(hw)
    row = s // w                       # h index of flattened position
    col = s % w                        # w index of flattened position
    ph = (row[:, None] == jnp.arange(h)[None, :]).astype(f32) / w        # (hw,h)
    pw = (col[:, None] == jnp.arange(w)[None, :]).astype(f32) / h        # (hw,w)
    rh = (jnp.arange(h)[:, None] == row[None, :]).astype(f32)            # (h,hw)
    rw = (jnp.arange(w)[:, None] == col[None, :]).astype(f32)            # (w,hw)

    x_flat = x.reshape(n, c, hw)       # free row-major reshape; lanes = H*W

    def full(shape):
        nd = len(shape)
        return pl.BlockSpec(shape, lambda b, _nd=nd: (0,) * _nd)

    # Per-sample fused tile footprint (double-buffered in + out stream):
    stream_bytes = 4 * c * hw * 4
    const_bytes = 2 * 2 * hw * (h + w) * 4
    fused_fits = (stream_bytes + const_bytes) < _FUSED_VMEM_BUDGET_BYTES

    if fused_fits and not force_two_pass:
        # ---- single pass: read x once, write out once ----
        out_flat = pl.pallas_call(
            fused_kernel,
            out_shape=jax.ShapeDtypeStruct((n, c, hw), x.dtype),
            grid=(n,),
            in_specs=[
                pl.BlockSpec((None, c, hw), lambda b: (b, 0, 0)),   # x (batch squeezed)
                full((hw, h)), full((hw, w)),                       # pooling matrices
                full((h, hw)), full((w, hw)),                       # expansion matrices
                full((mip, c)), full((mip, 1)),                     # conv1 (BN folded)
                full((oup, mip)), full((oup, 1)),                   # conv_h
                full((oup, mip)), full((oup, 1)),                   # conv_w
            ],
            out_specs=pl.BlockSpec((None, c, hw), lambda b: (b, 0, 0)),
            compiler_params=pltpu.CompilerParams(
                dimension_semantics=("parallel",)),
        )(x_flat, ph, pw, rh, rw, w1f, b1f,
          params["wh"], params["bh"], params["ww"], params["bw"])
        return out_flat.reshape(n, c, h, w)

    # ---- pass 1: per-sample gates ----
    a_h, a_w = pl.pallas_call(
        gates_kernel,
        out_shape=(jax.ShapeDtypeStruct((n, oup, h), f32),
                   jax.ShapeDtypeStruct((n, oup, w), f32)),
        grid=(n,),
        in_specs=[
            pl.BlockSpec((None, c, hw), lambda b: (b, 0, 0)),       # x (batch squeezed)
            full((hw, h)), full((hw, w)),                           # pooling matrices
            full((mip, c)), full((mip, 1)),                         # conv1 (BN folded)
            full((oup, mip)), full((oup, 1)),                       # conv_h
            full((oup, mip)), full((oup, 1)),                       # conv_w
        ],
        out_specs=(pl.BlockSpec((None, oup, h), lambda b: (b, 0, 0)),
                   pl.BlockSpec((None, oup, w), lambda b: (b, 0, 0))),
        compiler_params=pltpu.CompilerParams(
            dimension_semantics=("parallel",)),
    )(x_flat, ph, pw, w1f, b1f, params["wh"], params["bh"],
      params["ww"], params["bw"])

    # ---- pass 2: memory-bound gating multiply, (batch, channel-tile) grid ----
    tc = _pick_channel_tile(c)
    n_ct = c // tc
    out_flat = pl.pallas_call(
        gating_kernel,
        out_shape=jax.ShapeDtypeStruct((n, c, hw), x.dtype),
        grid=(n, n_ct),
        in_specs=[
            pl.BlockSpec((None, tc, hw), lambda b, ct: (b, ct, 0)),  # x tile
            pl.BlockSpec((None, tc, h), lambda b, ct: (b, ct, 0)),   # a_h tile
            pl.BlockSpec((None, tc, w), lambda b, ct: (b, ct, 0)),   # a_w tile
            pl.BlockSpec((h, hw), lambda b, ct: (0, 0)),             # R_h const
            pl.BlockSpec((w, hw), lambda b, ct: (0, 0)),             # R_w const
        ],
        out_specs=pl.BlockSpec((None, tc, hw), lambda b, ct: (b, ct, 0)),
        compiler_params=pltpu.CompilerParams(
            dimension_semantics=("parallel", "parallel")),
    )(x_flat, a_h, a_w, rh, rw)

    return out_flat.reshape(n, c, h, w)


# ---------------------------------------------------------------------------
# Pure-JAX reference mirroring the PyTorch CoordAtt forward (NCHW, eval BN).
# ---------------------------------------------------------------------------
def coord_att_reference(x, params):
    n, c, h, w = x.shape
    x_h = jnp.mean(x, axis=3)                       # (n, c, h)   pool over width
    x_w = jnp.mean(x, axis=2)                       # (n, c, w)   pool over height
    y = jnp.concatenate([x_h, x_w], axis=2)         # (n, c, h+w)
    y = jnp.einsum("oc,nck->nok", params["w1"], y) + params["b1"][None]
    inv = jax.lax.rsqrt(params["var"][None] + BN_EPS)
    y = (y - params["mean"][None]) * inv * params["gamma"][None] + params["beta"][None]
    y = y * jnp.clip(y + 3.0, 0.0, 6.0) / 6.0
    yh, yw = y[:, :, :h], y[:, :, h:]
    a_h = jax.nn.sigmoid(
        jnp.einsum("om,nmk->nok", params["wh"], yh) + params["bh"][None])  # (n,oup,h)
    a_w = jax.nn.sigmoid(
        jnp.einsum("om,nmk->nok", params["ww"], yw) + params["bw"][None])  # (n,oup,w)
    return x * a_w[:, :, None, :] * a_h[:, :, :, None]


def make_params(key, inp, oup, reduction=32):
    mip = max(8, inp // reduction)
    ks = jax.random.split(key, 8)
    return {
        "w1":    jax.random.normal(ks[0], (mip, inp), jnp.float32) * 0.5,
        "b1":    jax.random.normal(ks[1], (mip, 1), jnp.float32) * 0.1,
        "gamma": 1.0 + 0.1 * jax.random.normal(ks[2], (mip, 1), jnp.float32),
        "beta":  0.1 * jax.random.normal(ks[3], (mip, 1), jnp.float32),
        "mean":  0.1 * jax.random.normal(ks[4], (mip, 1), jnp.float32),
        "var":   0.5 + jnp.abs(jax.random.normal(ks[5], (mip, 1), jnp.float32)),
        "wh":    jax.random.normal(ks[6], (oup, mip), jnp.float32) * 0.5,
        "bh":    jnp.zeros((oup, 1), jnp.float32),
        "ww":    jax.random.normal(ks[7], (oup, mip), jnp.float32) * 0.5,
        "bw":    jnp.zeros((oup, 1), jnp.float32),
    }


if __name__ == "__main__":
    key = jax.random.PRNGKey(0)
    kx, kp = jax.random.split(key)

    n, c, h, w = 2, 4, 16, 16            # inp = oup = c (required for the gating)
    x = jax.random.normal(kx, (n, c, h, w), jnp.float32)
    params = make_params(kp, inp=c, oup=c, reduction=32)

    ref = coord_att_reference(x, params)

    # Fused single-pass path (default for sizes that fit in VMEM).
    out = jax.block_until_ready(coord_att(x, params))
    assert out.shape == (n, c, h, w)
    assert jnp.allclose(out, ref, atol=1e-4, rtol=1e-4), "fused path mismatch vs reference"

    # Two-pass fallback path (used for large per-sample tensors) — verify it too.
    out2 = jax.block_until_ready(coord_att(x, params, force_two_pass=True))
    assert jnp.allclose(out2, ref, atol=1e-4, rtol=1e-4), "two-pass path mismatch vs reference"

    print("KERNEL_OK")
</pallas_src>

<mosaic_0001>
module attributes {stable_mosaic.version = 11 : i64} {
  func.func @fused_kernel(%arg0: i32, %arg1: memref<1x4x256xf32, #tpu.memory_space<vmem>>, %arg2: memref<256x16xf32, #tpu.memory_space<vmem>>, %arg3: memref<256x16xf32, #tpu.memory_space<vmem>>, %arg4: memref<16x256xf32, #tpu.memory_space<vmem>>, %arg5: memref<16x256xf32, #tpu.memory_space<vmem>>, %arg6: memref<8x4xf32, #tpu.memory_space<vmem>>, %arg7: memref<8x1xf32, #tpu.memory_space<vmem>>, %arg8: memref<4x8xf32, #tpu.memory_space<vmem>>, %arg9: memref<4x1xf32, #tpu.memory_space<vmem>>, %arg10: memref<4x8xf32, #tpu.memory_space<vmem>>, %arg11: memref<4x1xf32, #tpu.memory_space<vmem>>, %arg12: memref<1x4x256xf32, #tpu.memory_space<vmem>>) attributes {dimension_semantics = [#tpu.dimension_semantics<parallel>], iteration_bounds = array<i64: 2>, scalar_prefetch = 0 : i64, scratch_operands = 0 : i64, tpu.core_type = #tpu.core_type<tc>, window_params = [{transform_indices = @transform_0, window_bounds = array<i64: 1, 4, 256>}, {pipeline_mode = #tpu.pipeline_mode<synchronous>, transform_indices = @transform_1, window_bounds = array<i64: 256, 16>}, {pipeline_mode = #tpu.pipeline_mode<synchronous>, transform_indices = @transform_2, window_bounds = array<i64: 256, 16>}, {pipeline_mode = #tpu.pipeline_mode<synchronous>, transform_indices = @transform_3, window_bounds = array<i64: 16, 256>}, {pipeline_mode = #tpu.pipeline_mode<synchronous>, transform_indices = @transform_4, window_bounds = array<i64: 16, 256>}, {pipeline_mode = #tpu.pipeline_mode<synchronous>, transform_indices = @transform_5, window_bounds = array<i64: 8, 4>}, {pipeline_mode = #tpu.pipeline_mode<synchronous>, transform_indices = @transform_6, window_bounds = array<i64: 8, 1>}, {pipeline_mode = #tpu.pipeline_mode<synchronous>, transform_indices = @transform_7, window_bounds = array<i64: 4, 8>}, {pipeline_mode = #tpu.pipeline_mode<synchronous>, transform_indices = @transform_8, window_bounds = array<i64: 4, 1>}, {pipeline_mode = #tpu.pipeline_mode<synchronous>, transform_indices = @transform_9, window_bounds = array<i64: 4, 8>}, {pipeline_mode = #tpu.pipeline_mode<synchronous>, transform_indices = @transform_10, window_bounds = array<i64: 4, 1>}, {transform_indices = @transform_11, window_bounds = array<i64: 1, 4, 256>}]} {
    %c0 = arith.constant 0 : index
    %c0_0 = arith.constant 0 : index
    %c0_1 = arith.constant 0 : index
    %0 = vector.load %arg1[%c0, %c0_0, %c0_1] : memref<1x4x256xf32, #tpu.memory_space<vmem>>, vector<1x4x256xf32>
    %1 = vector.shape_cast %0 : vector<1x4x256xf32> to vector<4x256xf32>
    %c0_2 = arith.constant 0 : index
    %c0_3 = arith.constant 0 : index
    %2 = vector.load %arg2[%c0_2, %c0_3] : memref<256x16xf32, #tpu.memory_space<vmem>>, vector<256x16xf32>
    %cst = arith.constant dense<0.000000e+00> : vector<4x16xf32>
    %3 = tpu.matmul %1, %2, %cst {dimension_numbers = #tpu.dot_dimension_numbers<[1], [0], [0], [1], [0, 0, 1, 1], [], []>} : vector<4x256xf32>, vector<256x16xf32>, vector<4x16xf32> -> vector<4x16xf32>
    %c0_4 = arith.constant 0 : index
    %c0_5 = arith.constant 0 : index
    %4 = vector.load %arg3[%c0_4, %c0_5] : memref<256x16xf32, #tpu.memory_space<vmem>>, vector<256x16xf32>
    %cst_6 = arith.constant dense<0.000000e+00> : vector<4x16xf32>
    %5 = tpu.matmul %1, %4, %cst_6 {dimension_numbers = #tpu.dot_dimension_numbers<[1], [0], [0], [1], [0, 0, 1, 1], [], []>} : vector<4x256xf32>, vector<256x16xf32>, vector<4x16xf32> -> vector<4x16xf32>
    %c0_7 = arith.constant 0 : index
    %c0_8 = arith.constant 0 : index
    %6 = vector.load %arg6[%c0_7, %c0_8] : memref<8x4xf32, #tpu.memory_space<vmem>>, vector<8x4xf32>
    %cst_9 = arith.constant dense<0.000000e+00> : vector<8x16xf32>
    %7 = tpu.matmul %6, %3, %cst_9 {dimension_numbers = #tpu.dot_dimension_numbers<[1], [0], [0], [1], [0, 0, 1, 1], [], []>} : vector<8x4xf32>, vector<4x16xf32>, vector<8x16xf32> -> vector<8x16xf32>
    %c0_10 = arith.constant 0 : index
    %c0_11 = arith.constant 0 : index
    %8 = vector.load %arg7[%c0_10, %c0_11] : memref<8x1xf32, #tpu.memory_space<vmem>>, vector<8x1xf32>
    %9 = vector.broadcast %8 : vector<8x1xf32> to vector<8x16xf32>
    %10 = arith.addf %7, %9 : vector<8x16xf32>
    %cst_12 = arith.constant 3.000000e+00 : f32
    %11 = vector.broadcast %cst_12 : f32 to vector<8x16xf32>
    %12 = arith.addf %10, %11 : vector<8x16xf32>
    %cst_13 = arith.constant 0.000000e+00 : f32
    %cst_14 = arith.constant 6.000000e+00 : f32
    %13 = vector.broadcast %cst_13 : f32 to vector<8x16xf32>
    %14 = arith.maximumf %13, %12 : vector<8x16xf32>
    %15 = vector.broadcast %cst_14 : f32 to vector<8x16xf32>
    %16 = arith.minimumf %15, %14 : vector<8x16xf32>
    %17 = arith.mulf %10, %16 : vector<8x16xf32>
    %cst_15 = arith.constant 0.166666672 : f32
    %18 = vector.broadcast %cst_15 : f32 to vector<8x16xf32>
    %19 = arith.mulf %17, %18 : vector<8x16xf32>
    %c0_16 = arith.constant 0 : index
    %c0_17 = arith.constant 0 : index
    %20 = vector.load %arg6[%c0_16, %c0_17] : memref<8x4xf32, #tpu.memory_space<vmem>>, vector<8x4xf32>
    %cst_18 = arith.constant dense<0.000000e+00> : vector<8x16xf32>
    %21 = tpu.matmul %20, %5, %cst_18 {dimension_numbers = #tpu.dot_dimension_numbers<[1], [0], [0], [1], [0, 0, 1, 1], [], []>} : vector<8x4xf32>, vector<4x16xf32>, vector<8x16xf32> -> vector<8x16xf32>
    %c0_19 = arith.constant 0 : index
    %c0_20 = arith.constant 0 : index
    %22 = vector.load %arg7[%c0_19, %c0_20] : memref<8x1xf32, #tpu.memory_space<vmem>>, vector<8x1xf32>
    %23 = vector.broadcast %22 : vector<8x1xf32> to vector<8x16xf32>
    %24 = arith.addf %21, %23 : vector<8x16xf32>
    %cst_21 = arith.constant 3.000000e+00 : f32
    %25 = vector.broadcast %cst_21 : f32 to vector<8x16xf32>
    %26 = arith.addf %24, %25 : vector<8x16xf32>
    %cst_22 = arith.constant 0.000000e+00 : f32
    %cst_23 = arith.constant 6.000000e+00 : f32
    %27 = vector.broadcast %cst_22 : f32 to vector<8x16xf32>
    %28 = arith.maximumf %27, %26 : vector<8x16xf32>
    %29 = vector.broadcast %cst_23 : f32 to vector<8x16xf32>
    %30 = arith.minimumf %29, %28 : vector<8x16xf32>
    %31 = arith.mulf %24, %30 : vector<8x16xf32>
    %cst_24 = arith.constant 0.166666672 : f32
    %32 = vector.broadcast %cst_24 : f32 to vector<8x16xf32>
    %33 = arith.mulf %31, %32 : vector<8x16xf32>
    %c0_25 = arith.constant 0 : index
    %c0_26 = arith.constant 0 : index
    %34 = vector.load %arg8[%c0_25, %c0_26] : memref<4x8xf32, #tpu.memory_space<vmem>>, vector<4x8xf32>
    %cst_27 = arith.constant dense<0.000000e+00> : vector<4x16xf32>
    %35 = tpu.matmul %34, %19, %cst_27 {dimension_numbers = #tpu.dot_dimension_numbers<[1], [0], [0], [1], [0, 0, 1, 1], [], []>} : vector<4x8xf32>, vector<8x16xf32>, vector<4x16xf32> -> vector<4x16xf32>
    %c0_28 = arith.constant 0 : index
    %c0_29 = arith.constant 0 : index
    %36 = vector.load %arg9[%c0_28, %c0_29] : memref<4x1xf32, #tpu.memory_space<vmem>>, vector<4x1xf32>
    %37 = vector.broadcast %36 : vector<4x1xf32> to vector<4x16xf32>
    %38 = arith.addf %35, %37 : vector<4x16xf32>
    %39 = arith.negf %38 : vector<4x16xf32>
    %40 = math.exp %39 : vector<4x16xf32>
    %cst_30 = arith.constant 1.000000e+00 : f32
    %41 = vector.broadcast %cst_30 : f32 to vector<4x16xf32>
    %42 = arith.addf %41, %40 : vector<4x16xf32>
    %43 = arith.divf %41, %42 : vector<4x16xf32>
    %c0_31 = arith.constant 0 : index
    %c0_32 = arith.constant 0 : index
    %44 = vector.load %arg10[%c0_31, %c0_32] : memref<4x8xf32, #tpu.memory_space<vmem>>, vector<4x8xf32>
    %cst_33 = arith.constant dense<0.000000e+00> : vector<4x16xf32>
    %45 = tpu.matmul %44, %33, %cst_33 {dimension_numbers = #tpu.dot_dimension_numbers<[1], [0], [0], [1], [0, 0, 1, 1], [], []>} : vector<4x8xf32>, vector<8x16xf32>, vector<4x16xf32> -> vector<4x16xf32>
    %c0_34 = arith.constant 0 : index
    %c0_35 = arith.constant 0 : index
    %46 = vector.load %arg11[%c0_34, %c0_35] : memref<4x1xf32, #tpu.memory_space<vmem>>, vector<4x1xf32>
    %47 = vector.broadcast %46 : vector<4x1xf32> to vector<4x16xf32>
    %48 = arith.addf %45, %47 : vector<4x16xf32>
    %49 = arith.negf %48 : vector<4x16xf32>
    %50 = math.exp %49 : vector<4x16xf32>
    %cst_36 = arith.constant 1.000000e+00 : f32
    %51 = vector.broadcast %cst_36 : f32 to vector<4x16xf32>
    %52 = arith.addf %51, %50 : vector<4x16xf32>
    %53 = arith.divf %51, %52 : vector<4x16xf32>
    %c0_37 = arith.constant 0 : index
    %c0_38 = arith.constant 0 : index
    %54 = vector.load %arg4[%c0_37, %c0_38] : memref<16x256xf32, #tpu.memory_space<vmem>>, vector<16x256xf32>
    %cst_39 = arith.constant dense<0.000000e+00> : vector<4x256xf32>
    %55 = tpu.matmul %43, %54, %cst_39 {dimension_numbers = #tpu.dot_dimension_numbers<[1], [0], [0], [1], [0, 0, 1, 1], [], []>} : vector<4x16xf32>, vector<16x256xf32>, vector<4x256xf32> -> vector<4x256xf32>
    %c0_40 = arith.constant 0 : index
    %c0_41 = arith.constant 0 : index
    %56 = vector.load %arg5[%c0_40, %c0_41] : memref<16x256xf32, #tpu.memory_space<vmem>>, vector<16x256xf32>
    %cst_42 = arith.constant dense<0.000000e+00> : vector<4x256xf32>
    %57 = tpu.matmul %53, %56, %cst_42 {dimension_numbers = #tpu.dot_dimension_numbers<[1], [0], [0], [1], [0, 0, 1, 1], [], []>} : vector<4x16xf32>, vector<16x256xf32>, vector<4x256xf32> -> vector<4x256xf32>
    %58 = arith.mulf %1, %55 : vector<4x256xf32>
    %59 = arith.mulf %58, %57 : vector<4x256xf32>
    %c0_43 = arith.constant 0 : index
    %c0_44 = arith.constant 0 : index
    %c0_45 = arith.constant 0 : index
    %60 = vector.load %arg12[%c0_43, %c0_44, %c0_45] : memref<1x4x256xf32, #tpu.memory_space<vmem>>, vector<1x4x256xf32>
    %61 = vector.shape_cast %60 : vector<1x4x256xf32> to vector<4x256xf32>
    %62 = vector.shape_cast %59 : vector<4x256xf32> to vector<1x4x256xf32>
    tpu.vector_store %arg12[%c0_43, %c0_44, %c0_45], %62 {strides = array<i32>} : memref<1x4x256xf32, #tpu.memory_space<vmem>>, vector<1x4x256xf32>,
    return
  }
  func.func @transform_0(%arg0: i32) -> (i32, i32, i32) {
    %c0_i32 = arith.constant 0 : i32
    %c0_i32_0 = arith.constant 0 : i32
    %c0_i32_1 = arith.constant 0 : i32
    return %arg0, %c0_i32, %c0_i32_0 : i32, i32, i32
  }
  func.func @transform_1(%arg0: i32) -> (i32, i32) {
    %c0_i32 = arith.constant 0 : i32
    %c0_i32_0 = arith.constant 0 : i32
    %c0_i32_1 = arith.constant 0 : i32
    return %c0_i32, %c0_i32_0 : i32, i32
  }
  func.func @transform_2(%arg0: i32) -> (i32, i32) {
    %c0_i32 = arith.constant 0 : i32
    %c0_i32_0 = arith.constant 0 : i32
    %c0_i32_1 = arith.constant 0 : i32
    return %c0_i32, %c0_i32_0 : i32, i32
  }
  func.func @transform_3(%arg0: i32) -> (i32, i32) {
    %c0_i32 = arith.constant 0 : i32
    %c0_i32_0 = arith.constant 0 : i32
    %c0_i32_1 = arith.constant 0 : i32
    return %c0_i32, %c0_i32_0 : i32, i32
  }
  func.func @transform_4(%arg0: i32) -> (i32, i32) {
    %c0_i32 = arith.constant 0 : i32
    %c0_i32_0 = arith.constant 0 : i32
    %c0_i32_1 = arith.constant 0 : i32
    return %c0_i32, %c0_i32_0 : i32, i32
  }
  func.func @transform_5(%arg0: i32) -> (i32, i32) {
    %c0_i32 = arith.constant 0 : i32
    %c0_i32_0 = arith.constant 0 : i32
    %c0_i32_1 = arith.constant 0 : i32
    return %c0_i32, %c0_i32_0 : i32, i32
  }
  func.func @transform_6(%arg0: i32) -> (i32, i32) {
    %c0_i32 = arith.constant 0 : i32
    %c0_i32_0 = arith.constant 0 : i32
    %c0_i32_1 = arith.constant 0 : i32
    return %c0_i32, %c0_i32_0 : i32, i32
  }
  func.func @transform_7(%arg0: i32) -> (i32, i32) {
    %c0_i32 = arith.constant 0 : i32
    %c0_i32_0 = arith.constant 0 : i32
    %c0_i32_1 = arith.constant 0 : i32
    return %c0_i32, %c0_i32_0 : i32, i32
  }
  func.func @transform_8(%arg0: i32) -> (i32, i32) {
    %c0_i32 = arith.constant 0 : i32
    %c0_i32_0 = arith.constant 0 : i32
    %c0_i32_1 = arith.constant 0 : i32
    return %c0_i32, %c0_i32_0 : i32, i32
  }
  func.func @transform_9(%arg0: i32) -> (i32, i32) {
    %c0_i32 = arith.constant 0 : i32
    %c0_i32_0 = arith.constant 0 : i32
    %c0_i32_1 = arith.constant 0 : i32
    return %c0_i32, %c0_i32_0 : i32, i32
  }
  func.func @transform_10(%arg0: i32) -> (i32, i32) {
    %c0_i32 = arith.constant 0 : i32
    %c0_i32_0 = arith.constant 0 : i32
    %c0_i32_1 = arith.constant 0 : i32
    return %c0_i32, %c0_i32_0 : i32, i32
  }
  func.func @transform_11(%arg0: i32) -> (i32, i32, i32) {
    %c0_i32 = arith.constant 0 : i32
    %c0_i32_0 = arith.constant 0 : i32
    %c0_i32_1 = arith.constant 0 : i32
    return %arg0, %c0_i32, %c0_i32_0 : i32, i32, i32
  }
}

</mosaic_0001>

<bundles_post_ra>
// kernel: tpu_custom_call.1
= control target key start
LH: loop header
LB: loop body
LE: loop exit
PB: predicated region body
PF: predicated region fallthrough
CT: control target
= control target key end

     0   :  { %16 = vsyncpa [#allocation3], 0  ;;  %s1901_s0 = inlined_call_operand.vmem [shape: f32[2,4,256], index: 0, kind: input, shape index: {}]   ;;  %s1902_s1 = inlined_call_operand.vmem [shape: f32[256,16], index: 1, kind: input, shape index: {}]   ;;  %s1903_s2 = inlined_call_operand.vmem [shape: f32[256,16], index: 2, kind: input, shape index: {}]   ;;  %s1904_s3 = inlined_call_operand.vmem [shape: f32[16,256], index: 3, kind: input, shape index: {}]   ;;  %s1905_s4 = inlined_call_operand.vmem [shape: f32[16,256], index: 4, kind: input, shape index: {}]   ;;  %s1906_s5 = inlined_call_operand.vmem [shape: f32[8,4], index: 5, kind: input, shape index: {}]   ;;  %s1907_s6 = inlined_call_operand.vmem [shape: f32[8,1], index: 6, kind: input, shape index: {}]   ;;  %s1908_s7 = inlined_call_operand.vmem [shape: f32[4,8], index: 7, kind: input, shape index: {}]   ;;  %s1909_s8 = inlined_call_operand.vmem [shape: f32[4,1], index: 8, kind: input, shape index: {}]   ;;  %s1910_s9 = inlined_call_operand.vmem [shape: f32[4,8], index: 9, kind: input, shape index: {}]   ;;  %s1911_s10 = inlined_call_operand.vmem [shape: f32[4,1], index: 10, kind: input, shape index: {}]   ;;  %s1912_s11 = inlined_call_operand.hbm [shape: f32[2,4,256], index: 11, kind: output, shape index: {}]  }
   0x1   :  { %18 = vsyncpa [#allocation3 + $0x1], 0  ;;  %s1551_s17 = smov 0   ;;  %s1553_s18 = smov 0  }
   0x2   :  { %s1555_s19 = smov 0   ;;  %s1557_s20 = smov 0  }
   0x3 LB: > { %1917 = sst [smem:[#allocation5_spill]] %s1481_s19  ;;  %s1572_s21 = sadd.s32 4294967295, %s1485_s20   ;;  %s1485_s20 = sphi %s1557_s20, %s1924_s20   ;;  %s1481_s19 = sphi %s1555_s19, %s1926_s19   ;;  %s1477_s18 = sphi %s1553_s18, %s1928_s18   ;;  %s1473_s17 = sphi %s1551_s17, %s1927_s17  }
   0x4   : > { %s1176_s22 = sadd.s32 4294967294, %s1485_s20   ;;  %s1576_s23 = sadd.s32 1, %s1485_s20  }
   0x5   : > { %1918 = sst [smem:[#allocation6_spill]] %s1576_s23  ;;  %s267_s24 = sadd.s32 1, %s1481_s19 }
   0x6   : > { %s264_s25 = ssub.s32 %s1485_s20, %s1576_s23  ;;  %p277_p0 = scmp.ne.s32.totalorder %s1481_s19, %s1477_s18 }
   0x7   : > { %p265_p1 = scmp.eq.s32.totalorder %s264_s25, 0  ;;  %p278_p2 = scmp.eq.s32.totalorder %s1572_s21, 1 }
   0x8   : > { %p283_p3 = scmp.ne.s32.totalorder %s1477_s18, %s1473_s17  ;;  %p284_p4 = scmp.eq.s32.totalorder %s1176_s22, 1 }
   0x9   : > { %s1587_s26 = scalar_select %p265_p1, %s1481_s19, %s267_s24  }
   0xa   : > { %p1589_p5 = por %p278_p2, %p277_p0  ;;  %p1593_p6 = por %p284_p4, %p283_p3 }
   0xb   : > { %1919 = sst [smem:[#allocation7_spill]] %s1587_s26  ;;  %p1179_p7 = scmp.ge.s32.totalorder %s1485_s20, 1 }
   0xc   : > { %s1921_s28 = scalar_select %p1593_p6, 1, 0 }
   0xd   : > { %p340_p8 = scmp.lt.s32.totalorder %s1485_s20, 3 }
   0xe   : > { %1922 = sst [smem:[#allocation8_spill]] %s1921_s28 }
   0xf   : > { %p341_p9 = pnand %p1179_p7, %p340_p8 }
  0x10   : > { %v402_v0 = vld [vmem:[%s1902_s1 + $0x80] sm:$0xff] (!%p341_p9)  ;;  %v403_v1 = vld [vmem:[%s1902_s1 + $0x88] sm:$0xff] (!%p341_p9)  ;;  %v404_v11 = vld [vmem:[%s1902_s1 + $0x90] sm:$0xff] (!%p341_p9)  ;;  %p380_p10 = scmp.lt.s32.totalorder (!%p341_p9), %s1572_s21, 1  ;;  %vm1488_vm0 = vmmov (!%p341_p9), 0   ;;  %vm604_vm1 = vcmask (!%p341_p9), 1043456  }
  0x11   : > { %344 = sbr.rel (%p341_p9) target bundleno = 966 (0x3c6), region = 64  ;;  %v507_v2 = vld [vmem:[%s1903_s2 + $0x80] sm:$0xff] (!%p341_p9)  ;;  %v1298_v3 = vpack.c.bf16 (!%p341_p9), %v403_v1, %v402_v0  ;;  %v508_v4 = vld [vmem:[%s1903_s2 + $0x88] sm:$0xff] (!%p341_p9)  ;;  %v405_v13 = vld [vmem:[%s1902_s1 + $0x98] sm:$0xff] (!%p341_p9)  ;;  %vm600_vm2 = vcmask (!%p341_p9), 31744   ;;  %vm768_vm3 = vcmask (!%p341_p9), 64512  }
  0x12   : > { %v386_v5 = vld [vmem:[%s1902_s1] sm:$0xff] (!%p341_p9)  ;;  %v387_v6 = vld [vmem:[%s1902_s1 + $0x8] sm:$0xff] (!%p341_p9)  ;;  %v1330_v7 = vpack.c.bf16 (!%p341_p9), %v508_v4, %v507_v2  ;;  %v509_v14 = vld [vmem:[%s1903_s2 + $0x90] sm:$0xff] (!%p341_p9)  ;;  %v1302_v16 = vpack.c.bf16 (!%p341_p9), %v405_v13, %v404_v11  ;;  %vm938_vm4 = vcmask (!%p341_p9), 130048   ;;  %s377_s12 = sand.u32 (!%p341_p9), 1, %s1477_s18   ;;  %s1199_s16 = sshll.u32 (!%p341_p9), %s1572_s21, 7 }
  0x13   : > { %v1300_v8 = vpack.c.bf16 (!%p341_p9), %v387_v6, %v386_v5  ;;  %v491_v9 = vld [vmem:[%s1903_s2] sm:$0xff] (!%p341_p9)  ;;  %v492_v10 = vld [vmem:[%s1903_s2 + $0x8] sm:$0xff] (!%p341_p9)  ;;  %1299 = vmatprep.subr.bf16.mxu0 (!%p341_p9), %v1298_v3  ;;  %v510_v15 = vld [vmem:[%s1903_s2 + $0x98] sm:$0xff] (!%p341_p9)  ;;  %s1180_s14 = sshll.u32 (!%p341_p9), %s377_s12, 3  ;;  %s1103_s26 = scalar_lea.sflag (!%p341_p9), [#allocation3], %s377_s12 }
  0x14   : > { %v1332_v12 = vpack.c.bf16 (!%p341_p9), %v492_v10, %v491_v9  ;;  %1331 = vmatprep.subr.bf16.mxu1 (!%p341_p9), %v1330_v7  ;;  %v1334_v17 = vpack.c.bf16 (!%p341_p9), %v510_v15, %v509_v14  ;;  %v388_v18 = vld [vmem:[%s1902_s1 + $0x10] sm:$0xff] (!%p341_p9)  ;;  %v389_v19 = vld [vmem:[%s1902_s1 + $0x18] sm:$0xff] (!%p341_p9)  ;;  %v406_v23 = vld [vmem:[%s1902_s1 + $0xa0] sm:$0xff] (!%p341_p9) }
  0x15   : > { %1301 = vmatpush3.bf16.msra.mxu0 (!%p341_p9), %v1300_v8  ;;  %v493_v20 = vld [vmem:[%s1903_s2 + $0x10] sm:$0xff] (!%p341_p9)  ;;  %v1304_v21 = vpack.c.bf16 (!%p341_p9), %v389_v19, %v388_v18  ;;  %v494_v22 = vld [vmem:[%s1903_s2 + $0x18] sm:$0xff] (!%p341_p9)  ;;  %v407_v24 = vld [vmem:[%s1902_s1 + $0xa8] sm:$0xff] (!%p341_p9) }
  0x16   : > { %1333 = vmatpush3.bf16.msra.mxu1 (!%p341_p9), %v1332_v12  ;;  %1303 = vmatprep.subr.bf16.mxu0 (!%p341_p9), %v1302_v16  ;;  %v1336_v25 = vpack.c.bf16 (!%p341_p9), %v494_v22, %v493_v20  ;;  %v1306_v26 = vpack.c.bf16 (!%p341_p9), %v407_v24, %v406_v23  ;;  %v511_v27 = vld [vmem:[%s1903_s2 + $0xa0] sm:$0xff] (!%p341_p9)  ;;  %v512_v28 = vld [vmem:[%s1903_s2 + $0xa8] sm:$0xff] (!%p341_p9)  ;;  %v408_v35 = vld [vmem:[%s1902_s1 + $0xb0] sm:$0xff] (!%p341_p9) }
  0x17   : > { %1335 = vmatprep.subr.bf16.mxu1 (!%p341_p9), %v1334_v17  ;;  %v390_v29 = vld [vmem:[%s1902_s1 + $0x20] sm:$0xff] (!%p341_p9)  ;;  %v1338_v30 = vpack.c.bf16 (!%p341_p9), %v512_v28, %v511_v27  ;;  %v391_v31 = vld [vmem:[%s1902_s1 + $0x28] sm:$0xff] (!%p341_p9)  ;;  %v409_v36 = vld [vmem:[%s1902_s1 + $0xb8] sm:$0xff] (!%p341_p9) }
  0x18   : > { %v495_v32 = vld [vmem:[%s1903_s2 + $0x20] sm:$0xff]  ;;  %v496_v33 = vld [vmem:[%s1903_s2 + $0x28] sm:$0xff]  ;;  %v1308_v34 = vpack.c.bf16 %v391_v31, %v390_v29  ;;  %v513_v37 = vld [vmem:[%s1903_s2 + $0xb0] sm:$0xff]  ;;  %v1310_v39 = vpack.c.bf16 %v409_v36, %v408_v35  ;;  %s1711_s15 = scalar_select %p380_p10, %s1572_s21, 1  ;;  %v1489_v36 = vmov 0  }
  0x19   : > { %1305 = vmatpush3.bf16.msra.mxu0 %v1304_v21  ;;  %v1340_v38 = vpack.c.bf16 %v496_v33, %v495_v32  ;;  %v514_v40 = vld [vmem:[%s1903_s2 + $0xb8] sm:$0xff]  ;;  %v392_v41 = vld [vmem:[%s1902_s1 + $0x30] sm:$0xff]  ;;  %v410_v46 = vld [vmem:[%s1902_s1 + $0xc0] sm:$0xff]  ;;  %1412 = vset.pattern.permute.xlu0 %v1489_v36  ;;  %s1490_s21 = smov [#allocation2]  }
  0x1a   : > { %1337 = vmatpush3.bf16.msra.mxu1 %v1336_v25  ;;  %1307 = vmatprep.subr.bf16.mxu0 %v1306_v26  ;;  %v393_v42 = vld [vmem:[%s1902_s1 + $0x38] sm:$0xff]  ;;  %v1342_v43 = vpack.c.bf16 %v514_v40, %v513_v37  ;;  %v497_v44 = vld [vmem:[%s1903_s2 + $0x30] sm:$0xff]  ;;  %v411_v47 = vld [vmem:[%s1902_s1 + $0xc8] sm:$0xff]  ;;  %s1198_s25 = sshll.u32 %s1711_s15, 3  ;;  %s1427_s23 = sshll.u32 %s1490_s21, 4  ;;  %s1428_s23 = int_to_ptr.vmem [resolvable:$false] %s1427_s23 }
  0x1b   : > { %1339 = vmatprep.subr.bf16.mxu1 %v1338_v30  ;;  %v498_v45 = vld [vmem:[%s1903_s2 + $0x38] sm:$0xff]  ;;  %v515_v48 = vld [vmem:[%s1903_s2 + $0xc0] sm:$0xff]  ;;  %v516_v49 = vld [vmem:[%s1903_s2 + $0xc8] sm:$0xff]  ;;  %v1312_v50 = vpack.c.bf16 %v393_v42, %v392_v41  ;;  %v1314_v52 = vpack.c.bf16 %v411_v47, %v410_v46  ;;  %s384_s13 = scalar_lea.vmem %s1901_s0, %s1198_s25  ;;  %1413 = vset.pattern.permute.xlu1 %v1489_v36  ;;  %s1859_s25 = scalar_lea.hbm %s1912_s11, %s1199_s16 }
  0x1c   : > { %v1344_v51 = vpack.c.bf16 %v498_v45, %v497_v44  ;;  %v394_v53 = vld [vmem:[%s1902_s1 + $0x40] sm:$0xff]  ;;  %v395_v54 = vld [vmem:[%s1902_s1 + $0x48] sm:$0xff]  ;;  %v1346_v56 = vpack.c.bf16 %v516_v49, %v515_v48  ;;  %v412_v58 = vld [vmem:[%s1902_s1 + $0xd0] sm:$0xff]  ;;  %s1429_s28 = scalar_lea.vmem %s1428_s23, 256 }
  0x1d   : > { %1309 = vmatpush3.bf16.msra.mxu0 %v1308_v34  ;;  %v499_v55 = vld [vmem:[%s1903_s2 + $0x40] sm:$0xff]  ;;  %v500_v57 = vld [vmem:[%s1903_s2 + $0x48] sm:$0xff]  ;;  %v413_v59 = vld [vmem:[%s1902_s1 + $0xd8] sm:$0xff]  ;;  %v1316_v62 = vpack.c.bf16 %v395_v54, %v394_v53  ;;  %v1487_v34 = vmov 0.0  }
  0x1e   : > { %1341 = vmatpush3.bf16.msra.mxu1 %v1340_v38  ;;  %1311 = vmatprep.subr.bf16.mxu0 %v1310_v39  ;;  %v517_v60 = vld [vmem:[%s1903_s2 + $0xd0] sm:$0xff]  ;;  %v518_v61 = vld [vmem:[%s1903_s2 + $0xd8] sm:$0xff]  ;;  %v1348_v63 = vpack.c.bf16 %v500_v57, %v499_v55  ;;  %v1318_v0 = vpack.c.bf16 %v413_v59, %v412_v58  ;;  %v414_v6 = vld [vmem:[%s1902_s1 + $0xe0] sm:$0xff] }
  0x1f   : > { %1343 = vmatprep.subr.bf16.mxu1 %v1342_v43  ;;  %v396_v1 = vld [vmem:[%s1902_s1 + $0x50] sm:$0xff]  ;;  %v397_v2 = vld [vmem:[%s1902_s1 + $0x58] sm:$0xff]  ;;  %v1350_v4 = vpack.c.bf16 %v518_v61, %v517_v60  ;;  %v415_v7 = vld [vmem:[%s1902_s1 + $0xe8] sm:$0xff] }
  0x20   : > { %v501_v3 = vld [vmem:[%s1903_s2 + $0x50] sm:$0xff]  ;;  %v502_v5 = vld [vmem:[%s1903_s2 + $0x58] sm:$0xff]  ;;  %v519_v8 = vld [vmem:[%s1903_s2 + $0xe0] sm:$0xff]  ;;  %v1320_v10 = vpack.c.bf16 %v397_v2, %v396_v1  ;;  %v1322_v13 = vpack.c.bf16 %v415_v7, %v414_v6 }
  0x21   : > { %1313 = vmatpush3.bf16.msra.mxu0 %v1312_v50  ;;  %v520_v9 = vld [vmem:[%s1903_s2 + $0xe8] sm:$0xff]  ;;  %v398_v11 = vld [vmem:[%s1902_s1 + $0x60] sm:$0xff]  ;;  %v1352_v12 = vpack.c.bf16 %v502_v5, %v501_v3  ;;  %v416_v19 = vld [vmem:[%s1902_s1 + $0xf0] sm:$0xff] }
  0x22   : > { %1345 = vmatpush3.bf16.msra.mxu1 %v1344_v51  ;;  %1315 = vmatprep.subr.bf16.mxu0 %v1314_v52  ;;  %v399_v14 = vld [vmem:[%s1902_s1 + $0x68] sm:$0xff]  ;;  %v503_v15 = vld [vmem:[%s1903_s2 + $0x60] sm:$0xff]  ;;  %v1354_v17 = vpack.c.bf16 %v520_v9, %v519_v8  ;;  %v417_v20 = vld [vmem:[%s1902_s1 + $0xf8] sm:$0xff] }
  0x23   : > { %1347 = vmatprep.subr.bf16.mxu1 %v1346_v56  ;;  %v1774_v16 = vld [vmem:[%s384_s13] sm:$0xff]  ;;  %v504_v18 = vld [vmem:[%s1903_s2 + $0x68] sm:$0xff]  ;;  %v521_v22 = vld [vmem:[%s1903_s2 + $0xf0] sm:$0xff]  ;;  %v1324_v24 = vpack.c.bf16 %v399_v14, %v398_v11  ;;  %v1326_v26 = vpack.c.bf16 %v417_v20, %v416_v19  ;;  %s379_s13 = scalar_lea.vmem [#allocation2], %s1180_s14 }
  0x24   : > { %v419_v21 = vcombine.high %v1774_v16, %v1774_v16  ;;  %v522_v23 = vld [vmem:[%s1903_s2 + $0xf8] sm:$0xff]  ;;  %v1356_v25 = vpack.c.bf16 %v504_v18, %v503_v15  ;;  %v400_v27 = vld [vmem:[%s1902_s1 + $0x70] sm:$0xff]  ;;  %v594_v35 = vld [vmem:[%s1907_s6] sm:$0xff]  ;;  %s1117_s15 = sshll.u32 %s379_s13, 4  ;;  %s1861_s15 = int_to_ptr.vmem [resolvable:$true] %s1117_s15 }
  0x25   : > { %1317 = vmatpush3.bf16.msra.mxu0 %v1316_v62  ;;  %v401_v28 = vld [vmem:[%s1902_s1 + $0x78] sm:$0xff]  ;;  %v1358_v29 = vpack.c.bf16 %v522_v23, %v521_v22  ;;  %v505_v30 = vld [vmem:[%s1903_s2 + $0x70] sm:$0xff]  ;;  %597 = vperm.xlu0 %1412, %v594_v35   ;;  %v762_v37 = vld [vmem:[%s1909_s8] sm:$0xf]  ;;  %s1423_s19 = scalar_lea.vmem %s1861_s15, 128  ;;  %p1430_p0 = scmp.lt.s32.totalorder %s1861_s15, %s1428_s23 }
  0x26   : > { %1349 = vmatpush3.bf16.msra.mxu1 %v1348_v63  ;;  %1319 = vmatprep.subr.bf16.mxu0 %v1318_v0  ;;  %v506_v31 = vld [vmem:[%s1903_s2 + $0x78] sm:$0xff]  ;;  %v1328_v32 = vpack.c.bf16 %v401_v28, %v400_v27  ;;  %v593_v43 = vld [vmem:[%s1906_s5] sm:$0xff]  ;;  %v935_v1 = vld [vmem:[%s1904_s3 + $0x8] sm:$0xff]  ;;  %p1424_p11 = scmp.ne.s32.totalorder %s1861_s15, %s1423_s19  ;;  %p1431_p1 = scmp.lt.s32.totalorder %s1429_s28, %s1423_s19 }
  0x27   : > { %1351 = vmatprep.subr.bf16.mxu1 %v1350_v4  ;;  %485 = vmatprep.mubr.f32.mxu0 %v419_v21  ;;  %v1360_v33 = vpack.c.bf16 %v506_v31, %v505_v30  ;;  %v849_v45 = vld [vmem:[%s1911_s10] sm:$0xf]  ;;  %v937_v2 = vld [vmem:[%s1904_s3 + $0x18] sm:$0xff]  ;;  %v936_v5 = vld [vmem:[%s1904_s3 + $0x10] sm:$0xff] }
  0x28   : > { %587 = vmatprep.mubr.f32.mxu1 %v419_v21  ;;  %852 = vperm.xlu1 %1413, %v849_v45   ;;  %v761_v62 = vld [vmem:[%s1908_s7] sm:$0xf]  ;;  %v1362_v4 = vpack.c.bf16 %v937_v2, %v935_v1  ;;  %v1014_v6 = vld [vmem:[%s1905_s4 + $0x8] sm:$0xff]  ;;  %v1016_v7 = vld [vmem:[%s1905_s4 + $0x18] sm:$0xff]  ;;  %p1425_p12 = pnand %p1424_p11, %p1589_p5  ;;  %p1432_p2 = por %p1431_p1, %p1430_p0 }
  0x29   : > { %1321 = vmatpush3.bf16.msra.mxu0 %v1320_v10  ;;  %765 = vperm.xlu0 %1412, %v762_v37   ;;  %v848_v0 = vld [vmem:[%s1910_s9] sm:$0xf]  ;;  %v1366_v9 = vpack.c.bf16 %v1016_v7, %v1014_v6  ;;  %v1015_v11 = vld [vmem:[%s1905_s4 + $0x10] sm:$0xff] }
  0x2a   : > { %1353 = vmatpush3.bf16.msra.mxu1 %v1352_v12  ;;  %1323 = vmatprep.subr.bf16.mxu0 %v1322_v13  ;;  %v934_v3 = vld [vmem:[%s1904_s3] sm:$0xff]  ;;  %p1426_p13 = pneg %p1425_p12 }
  0x2b   : > { %1355 = vmatprep.subr.bf16.mxu1 %v1354_v17  ;;  %v1364_v8 = vpack.c.bf16 %v936_v5, %v934_v3  ;;  %v1013_v10 = vld [vmem:[%s1905_s4] sm:$0xff] }
  0x2c   : > { %v1368_v12 = vpack.c.bf16 %v1015_v11, %v1013_v10  ;;  %p1433_p3 = pnand %p1432_p2, %p1426_p13 }
  0x2d   : > { %1325 = vmatpush3.bf16.msra.mxu0 %v1324_v24 }
  0x2e   : > { %1357 = vmatpush3.bf16.msra.mxu1 %v1356_v25  ;;  %1327 = vmatprep.subr.bf16.mxu0 %v1326_v26 }
  0x2f   : > { %1359 = vmatprep.subr.bf16.mxu1 %v1358_v29 }
  0x31   : > { %1329 = vmatpush3.bf16.msra.mxu0 %v1328_v32 }
  0x32   : > { %1361 = vmatpush3.bf16.msra.mxu1 %v1360_v33  ;;  %1278 = vmatprep.subr.mxu0 %v1487_v34 }
  0x33   : > { %1283 = vmatprep.subr.mxu1 %v1487_v34 }
  0x34   : > { %486 = vmatmul.mubr.f32.vlgmr.msra.gmra.mrb[0].mxu0 %v1774_v16 }
  0x35   : > { %588 = vmatmul.mubr.f32.vlgmr.msra.gmra.mrb[0].mxu1 %v1774_v16  ;;  %1280 = vmatprep.mubr.msk.f32.mxu0 %vm1488_vm0, %v1487_v34 }
  0x36   : > { %1285 = vmatprep.mubr.msk.f32.mxu1 %vm1488_vm0, %v1487_v34 }
  0xa4   : > { %v598_v46 = vpop.permute.xlu0 %597 }
  0xa7   : > { %v853_v13 = vpop.permute.xlu1 %852 }
  0xa8   : > { %v766_v14 = vpop.permute.xlu0 %765 }
 0x107   : > { %v1232_v38 = vpop.f32.mrb[0].mxu0 }
 0x108   : > { %v1267_v39 = vpop.f32.mrb[0].mxu1  ;;  %v1233_v40 = vpop.f32.mrb[1].mxu0 }
 0x109   : > { %v1234_v41 = vadd.f32 %v1233_v40, %v1232_v38  ;;  %v1268_v42 = vpop.f32.mrb[1].mxu1 }
 0x10a   : > { %v1269_v44 = vadd.f32 %v1268_v42, %v1267_v39 }
 0x10b   : > { %1279 = vmatpush3.msk.msra.mxu0 %vm604_vm1, %v1234_v41 }
 0x10c   : > { %1284 = vmatpush3.msk.msra.mxu1 %vm604_vm1, %v1269_v44  ;;  %1281 = vmatmul.mubr.msk.f32.vlgmr.msra.gmra.mrb[2].mxu0 %vm600_vm2, %v593_v43 }
 0x10d   : > { %1286 = vmatmul.mubr.msk.f32.vlgmr.msra.gmra.mrb[2].mxu1 %vm600_vm2, %v593_v43  ;;  %1288 = vmatprep.subr.mxu0 %v1487_v34 }
 0x10e   : > { %1293 = vmatprep.subr.mxu1 %v1487_v34  ;;  %1290 = vmatprep.mubr.msk.f32.mxu0 %vm1488_vm0, %v1487_v34 }
 0x10f   : > { %1295 = vmatprep.mubr.msk.f32.mxu1 %vm1488_vm0, %v1487_v34 }
 0x1df   : > { %v674_v47 = vpop.f32.mrb[2].mxu0 }
 0x1e0   : > { %v675_v48 = vadd.f32 %v674_v47, %v598_v46  ;;  %v752_v49 = vpop.f32.mrb[2].mxu1  ;;  %v1282_v50 = vpop.f32.mrb[3].mxu0 }
 0x1e1   : > { %v753_v51 = vadd.f32 %v752_v49, %v598_v46  ;;  %v1287_v52 = vpop.f32.mrb[3].mxu1 }
 0x1e2   : > { %v678_v53 = vadd.f32 3.0, %v675_v48 }
 0x1e3   : > { %v756_v54 = vadd.f32 3.0, %v753_v51 }
 0x1e4   : > { %v679_v55 = vmax.f32 %v678_v53, 0.0 }
 0x1e5   : > { %v757_v56 = vmax.f32 %v756_v54, 0.0 }
 0x1e6   : > { %v680_v57 = vmin.f32 %v679_v55, 6.0 }
 0x1e7   : > { %v758_v58 = vmin.f32 %v757_v56, 6.0 }
 0x1e8   : > { %v681_v59 = vmul.f32 %v680_v57, %v675_v48 }
 0x1e9   : > { %v759_v60 = vmul.f32 %v758_v58, %v753_v51 }
 0x1ea   : > { %v682_v61 = vmul.f32 0.16666667, %v681_v59 }
 0x1eb   : > { %v760_v63 = vmul.f32 0.16666667, %v759_v60 }
 0x1ec   : > { %1289 = vmatpush3.msra.mxu0 %v682_v61 }
 0x1ed   : > { %1294 = vmatpush3.msra.mxu1 %v760_v63  ;;  %1291 = vmatmul.mubr.msk.f32.vlgmr.msra.gmra.mrb[4].mxu0 %vm768_vm3, %v761_v62 }
 0x1ee   : > { %1296 = vmatmul.mubr.msk.f32.vlgmr.msra.gmra.mrb[4].mxu1 %vm768_vm3, %v848_v0  ;;  %1006 = vmatprep.mubr.f32.mxu0 %v1487_v34 }
 0x1ef   : > { %1084 = vmatprep.mubr.f32.mxu1 %v1487_v34  ;;  %1363 = vmatprep.subr.bf16.mxu0 %v1362_v4 }
 0x1f0   : > { %1365 = vmatpush1.bf16.msra.mxu0 %v1364_v8  ;;  %1367 = vmatprep.subr.bf16.mxu1 %v1366_v9 }
 0x1f1   : > { %1369 = vmatpush1.bf16.msra.mxu1 %v1368_v12 }
 0x2c0   : > { %v838_v15 = vpop.f32.mrb[4].mxu0 }
 0x2c1   : > { %v839_v17 = vadd.f32 %v838_v15, %v766_v14  ;;  %v924_v18 = vpop.f32.mrb[4].mxu1  ;;  %v1292_v19 = vpop.f32.mrb[5].mxu0 }
 0x2c2   : > { %v925_v20 = vadd.f32 %v924_v18, %v853_v13  ;;  %v1297_v21 = vpop.f32.mrb[5].mxu1 }
 0x2c3   : > { %v1188_v22 = vmul.f32 -1.442695, %v839_v17 }
 0x2c4   : > { %v1190_v23 = vmul.f32 -1.442695, %v925_v20 }
 0x2c5   : > { %1415 = vpow2.f32 %v1188_v22 }
 0x2c6   : > { %1417 = vpow2.f32 %v1190_v23 }
 0x2cf   : > { %v1416_v24 = vpop.eup %1415 }
 0x2d0   : > { %v1418_v25 = vpop.eup %1417  ;;  %v845_v26 = vadd.f32 1.0, %v1416_v24 }
 0x2d1   : > { %v931_v27 = vadd.f32 1.0, %v1418_v25 }
 0x2d2   : > { %1419 = vrcp.f32 %v845_v26 }
 0x2d3   : > { %1421 = vrcp.f32 %v931_v27 }
 0x2dc   : > { %v1420_v28 = vpop.eup %1419 }
 0x2dd   : > { %v1422_v29 = vpop.eup %1421  ;;  %1191 = vmatmul.mubr.msk.f32.vlgmr.msra.gmra.mrb[6].mxu0 %vm938_vm4, %v1420_v28 }
 0x2de   : > { %1192 = vmatmul.mubr.msk.f32.vlgmr.msra.gmra.mrb[6].mxu1 %vm938_vm4, %v1422_v29 }
 0x3b0   : > { %v1008_v30 = vpop.f32.mrb[6].mxu0 }
 0x3b1   : > { %v1010_v31 = vpop.f32.mrb[7].mxu0  ;;  %v1086_v32 = vpop.f32.mrb[6].mxu1 }
 0x3b2   : > { %v1093_v33 = vcombine.low %v1008_v30, %v1010_v31  ;;  %v1088_v34 = vpop.f32.mrb[7].mxu1 }
 0x3b3   : > { %v1098_v35 = vcombine.low %v1086_v32, %v1088_v34 }
 0x3b4   : > { %v1095_v36 = vmul.f32 %v1093_v33, %v1774_v16 }
 0x3b6   : > { %v1100_v37 = vmul.f32 %v1098_v35, %v1095_v36 }
 0x3b8   : > { %1101 = vst [vmem:[%s379_s13] sm:$0xff] %v1100_v37 }
 0x3b9   : > { %1436 = shalt.err (!%p1433_p3)
}
 0x3ba   : > { %s1437_s29 = scalar_lea.hbm %s1859_s25, 128  ;;  %s1441_s14 = scalar_lea.hbm %s1912_s11, 256 }
 0x3bb   : > { %p1438_p4 = scmp.ne.s32.totalorder %s1859_s25, %s1437_s29  ;;  %p1442_p9 = scmp.lt.u32.totalorder %s1859_s25, %s1912_s11 }
 0x3bc   : > { %p1443_p10 = scmp.lt.u32.totalorder %s1441_s14, %s1437_s29  ;;  %p1445_p12 = scmp.lt.u32.totalorder %s1437_s29, %s1859_s25 }
 0x3bd   : > { %p1439_p7 = pnand %p1438_p4, %p1589_p5 }
 0x3be   : > { %p1444_p11 = por %p1443_p10, %p1442_p9 }
 0x3bf   : > { %p1440_p8 = pneg %p1439_p7 }
 0x3c0   : > { %p1446_p13 = por %p1445_p12, %p1444_p11 }
 0x3c2   : > { %p1447_p0 = pnand %p1446_p13, %p1440_p8 }
 0x3c4   : > { %1450 = shalt.err (!%p1447_p0)
}
 0x3c5   : > { %1370 = dma.vmem_to_hbm [thread:$0]  (%p1589_p5), %s1861_s15, 128, %s1859_s25, %s1103_s26  }
 0x3c6 PF: > { %p1376_p1 = scmp.ge.s32.totalorder %s1485_s20, 2  ;;  %s1129_s24 = sand.u32 1, %s1473_s17  }
 0x3c7   : > { %s1130_s19 = scalar_lea.sflag [#allocation3], %s1129_s24 }
 0x3c8   : > { %p1373_p2 = pnand %p1376_p1, %p1593_p6 }
 0x3ca   : > { %1468 = dma.done.wait (!%p1373_p2), %s1130_s19, 128  }
 0x3cb   : > { %1470 = vsyncadd (!%p1373_p2), %s1130_s19, 4294967168  ;;  %s1924_s20 = sld [smem:[#allocation6_spill]]  ;;  %s1925_s21 = sld [smem:[#allocation5_spill]] }
 0x3cc   : > { %s1926_s19 = sld [smem:[#allocation7_spill]]  ;;  %s1927_s17 = smov %s1477_s18 }
 0x3d1   : > { %p21_p3 = scmp.ge.s32.totalorder %s1924_s20, 4   ;;  %s1928_s18 = smov %s1925_s21 }
 0x3d3   :  { %23 = sbr.rel (!%p21_p3) target bundleno = 3 (0x3), region = 99 }
 0x3da   :  { %1135 = vsyncpa [#allocation3], 1 }
 0x3db   :  { %1137 = vsyncpa [#allocation3 + $0x1], 1 }

</bundles_post_ra>
